<compile_context>
chip_gen: v6e
topology: v6e:2x2x1
jax: 0.10.0
libtpu: 0.0.40
codegen_flags: <defaults>
</compile_context>

<pallas_src>
import functools

import numpy as np
import jax
import jax.numpy as jnp
from jax.experimental import pallas as pl
from jax.experimental.pallas import tpu as pltpu


# Conservative planning budget for picking "one big block vs. tiled" — leaves
# headroom under the scoped VMEM limit on every generation (v5e default 16 MiB
# scoped, v7x 64 MiB physical) including double-buffering on gridded paths.
_VMEM_PLAN_BUDGET = 8 * 1024 * 1024
# Explicit scoped-VMEM request: safe on v5e (128 MiB phys), v6e (128 MiB phys)
# and v7x (64 MiB phys / 32 MiB default scoped).
_VMEM_LIMIT_BYTES = 32 * 1024 * 1024


def _compiler_params(dimension_semantics=None):
    return pltpu.CompilerParams(dimension_semantics=dimension_semantics,
                                vmem_limit_bytes=_VMEM_LIMIT_BYTES)


# ----------------------------------------------------------------------------
# Unbatched kernel: selection mask built in-kernel (no weight input / DMA),
# one (2, n) x (n, D) MXU matmul with f32 accumulation, scaled by 1/n_shot.
# Works unchanged for a lane-tiled (n, tD) -> (2, tD) block.
# ----------------------------------------------------------------------------
def _class_proto_iota_kernel(s_ref, o_ref, *, n_shot, inv):
    n_support = s_ref.shape[0]
    c = jax.lax.broadcasted_iota(jnp.int32, (2, n_support), 0)   # class row
    j = jax.lax.broadcasted_iota(jnp.int32, (2, n_support), 1)   # support index
    pos = (c == 0) & (j < n_shot)
    neg = (c == 1) & (j >= n_shot) & (j < 2 * n_shot)
    w = (pos | neg).astype(s_ref.dtype)                          # 0/1, MXU-native dtype
    acc = jnp.dot(w, s_ref[...], preferred_element_type=jnp.float32)   # (2, tD) f32
    o_ref[...] = (acc * jnp.float32(inv)).astype(o_ref.dtype)


@jax.jit
def class_proto_forward(s_emb):
    """Unbatched ClassProto.forward: (n_support, D) -> (1, 2*D)."""
    n_support, d = s_emb.shape
    n_shot = n_support // 2
    # n_shot == 0 -> NaN, matching the PyTorch mean-of-empty behaviour.
    inv = (1.0 / n_shot) if n_shot > 0 else float("nan")
    itemsize = s_emb.dtype.itemsize
    kernel = functools.partial(_class_proto_iota_kernel, n_shot=n_shot, inv=inv)

    full_bytes = (n_support + 2) * d * itemsize
    if full_bytes <= _VMEM_PLAN_BUDGET or d % 128 != 0:
        # Small / typical case: single full-array VMEM block, no grid.
        proto = pl.pallas_call(
            kernel,
            out_shape=jax.ShapeDtypeStruct((2, d), s_emb.dtype),
            in_specs=[pl.BlockSpec(memory_space=pltpu.MemorySpace.VMEM)],
            out_specs=pl.BlockSpec(memory_space=pltpu.MemorySpace.VMEM),
            compiler_params=_compiler_params(),
        )(s_emb)
    else:
        # Very large D: lane-dense tiles over the embedding dimension.
        per_lane = 2 * (n_support + 2) * itemsize   # double-buffered in+out per lane
        td = 128
        for cand in range(d, 127, -128):
            if d % cand == 0 and cand * per_lane <= _VMEM_PLAN_BUDGET:
                td = cand
                break
        proto = pl.pallas_call(
            kernel,
            out_shape=jax.ShapeDtypeStruct((2, d), s_emb.dtype),
            grid=(d // td,),
            in_specs=[pl.BlockSpec((n_support, td), lambda i: (0, i))],
            out_specs=pl.BlockSpec((2, td), lambda i: (0, i)),
            compiler_params=_compiler_params(("parallel",)),
        )(s_emb)

    # torch.cat((pos, neg), -1): (2, D) row-major -> (1, 2*D) is a free reshape.
    return proto.reshape(1, 2 * d)


# ----------------------------------------------------------------------------
# Batched path: one (2*Bt, Bt*n) x (Bt*n, D) MXU matmul per block producing a
# sublane/lane-contiguous (2*Bt, D) output slab.
# ----------------------------------------------------------------------------
def _class_proto_matmul_kernel(w_ref, s_ref, o_ref, *, inv):
    acc = jnp.dot(w_ref[...], s_ref[...], preferred_element_type=jnp.float32)
    o_ref[...] = (acc * jnp.float32(inv)).astype(o_ref.dtype)


def _block_diag_weights(bt, n_support, n_shot, dtype):
    """(2*bt, bt*n_support) block-diagonal 0/1 selection matrix (trace-time const).

    Row 2*b selects the positive shots of episode b, row 2*b+1 the negatives.
    Built with 0/1 entries (exact in any dtype); 1/n_shot scaling happens after
    the f32-accumulated matmul.
    """
    w = np.zeros((2 * bt, bt * n_support), dtype=np.float32)
    if n_shot > 0:
        for b in range(bt):
            base = b * n_support
            w[2 * b, base:base + n_shot] = 1.0
            w[2 * b + 1, base + n_shot:base + 2 * n_shot] = 1.0
    return jnp.asarray(w, dtype=dtype)


def _choose_block_episodes(b, n_support, d, itemsize):
    """Largest Bt (episodes per grid step) meeting tiling + VMEM constraints."""
    for bt in range(b // 2, 0, -1):
        if b % bt:
            continue
        # (8, 128) sublane constraint on the blocked (second-to-last) dims.
        if (2 * bt) % 8 or (bt * n_support) % 8:
            continue
        blk = (2 * (bt * n_support * d)        # double-buffered input block
               + 2 * (2 * bt * d)              # double-buffered output block
               + (2 * bt) * (bt * n_support)   # weight block (index-invariant)
               ) * itemsize
        if blk <= _VMEM_PLAN_BUDGET:
            return bt
    return b   # fallback: single block


def _class_proto_forward_batched_impl(s_emb_b, *, block_episodes=None):
    """Batched ClassProto.forward over episodes: (B, n_support, D) -> (B, 1, 2*D)."""
    b, n_support, d = s_emb_b.shape
    n_shot = n_support // 2
    inv = (1.0 / n_shot) if n_shot > 0 else float("nan")
    itemsize = s_emb_b.dtype.itemsize
    s_flat = s_emb_b.reshape(b * n_support, d)          # free row-major reshape
    kernel = functools.partial(_class_proto_matmul_kernel, inv=inv)

    bt = block_episodes
    if bt is None:
        full_bytes = (b * n_support * d + 2 * b * d
                      + (2 * b) * (b * n_support)) * itemsize
        bt = b if full_bytes <= _VMEM_PLAN_BUDGET else \
            _choose_block_episodes(b, n_support, d, itemsize)
    else:
        if b % bt:
            raise ValueError("block_episodes must divide the batch size")
        if bt != b and ((2 * bt) % 8 or (bt * n_support) % 8):
            raise ValueError("block_episodes violates the (8, 128) tiling rule")

    w = _block_diag_weights(bt, n_support, n_shot, s_emb_b.dtype)

    if bt == b:
        # Whole batch in one VMEM block: no grid, no per-step pipeline overhead.
        proto = pl.pallas_call(
            kernel,
            out_shape=jax.ShapeDtypeStruct((2 * b, d), s_emb_b.dtype),
            in_specs=[pl.BlockSpec(memory_space=pltpu.MemorySpace.VMEM),
                      pl.BlockSpec(memory_space=pltpu.MemorySpace.VMEM)],
            out_specs=pl.BlockSpec(memory_space=pltpu.MemorySpace.VMEM),
            compiler_params=_compiler_params(),
        )(w, s_flat)
    else:
        # bt episodes per grid step; the weight block is index-invariant.
        proto = pl.pallas_call(
            kernel,
            out_shape=jax.ShapeDtypeStruct((2 * b, d), s_emb_b.dtype),
            grid=(b // bt,),
            in_specs=[pl.BlockSpec((2 * bt, bt * n_support), lambda i: (0, 0)),
                      pl.BlockSpec((bt * n_support, d), lambda i: (i, 0))],
            out_specs=pl.BlockSpec((2 * bt, d), lambda i: (i, 0)),
            compiler_params=_compiler_params(("parallel",)),
        )(w, s_flat)

    # (2B, D) slab rows are [pos_0, neg_0, pos_1, neg_1, ...]:
    # row-major reshape to (B, 1, 2*D) is exactly concat([pos, neg], -1) per episode.
    return proto.reshape(b, 1, 2 * d)


def make_class_proto_forward_batched(block_episodes=None):
    return jax.jit(functools.partial(_class_proto_forward_batched_impl,
                                     block_episodes=block_episodes))


class_proto_forward_batched = make_class_proto_forward_batched()


# ----------------------------------------------------------------------------
# Pure-JAX reference mirroring the PyTorch forward.
# ----------------------------------------------------------------------------
def class_proto_reference(s_emb):
    n_support = s_emb.shape[0]
    n_shot = n_support // 2
    pos = jnp.mean(s_emb[:n_shot], axis=0, keepdims=True)
    neg = jnp.mean(s_emb[n_shot:2 * n_shot], axis=0, keepdims=True)
    return jnp.concatenate([pos, neg], axis=-1)


if __name__ == "__main__":
    n_support, inp_dim = 8, 32
    key = jax.random.PRNGKey(0)
    k1, k2, k3 = jax.random.split(key, 3)

    # ---- unbatched (matches the PyTorch module API exactly) ----
    s_emb = jax.random.normal(k1, (n_support, inp_dim), dtype=jnp.float32)
    out = jax.block_until_ready(class_proto_forward(s_emb))
    ref = class_proto_reference(s_emb)
    assert out.shape == (1, 2 * inp_dim), out.shape
    assert jnp.allclose(out, ref, atol=1e-5, rtol=1e-5), "unbatched mismatch"

    # ---- batched, single full-array block (no grid) ----
    B = 4
    s_b = jax.random.normal(k2, (B, n_support, inp_dim), dtype=jnp.float32)
    out_b = jax.block_until_ready(class_proto_forward_batched(s_b))
    ref_b = jax.vmap(class_proto_reference)(s_b)
    assert out_b.shape == (B, 1, 2 * inp_dim), out_b.shape
    assert jnp.allclose(out_b, ref_b, atol=1e-5, rtol=1e-5), "batched mismatch"

    # ---- batched, tiled grid (4 episodes / step -> 4 steps) ----
    B2 = 16
    s_b2 = jax.random.normal(k3, (B2, n_support, inp_dim), dtype=jnp.float32)
    tiled_fn = make_class_proto_forward_batched(block_episodes=4)
    out_b2 = jax.block_until_ready(tiled_fn(s_b2))
    ref_b2 = jax.vmap(class_proto_reference)(s_b2)
    assert out_b2.shape == (B2, 1, 2 * inp_dim), out_b2.shape
    assert jnp.allclose(out_b2, ref_b2, atol=1e-5, rtol=1e-5), "tiled batched mismatch"

    print("KERNEL_OK")
</pallas_src>

<mosaic_0001>
module attributes {stable_mosaic.version = 11 : i64} {
  func.func @_class_proto_iota_kernel(%arg0: memref<8x32xf32, #tpu.memory_space<vmem>>, %arg1: memref<2x32xf32, #tpu.memory_space<vmem>>) attributes {dimension_semantics = [], scalar_prefetch = 0 : i64, scratch_operands = 0 : i64, tpu.core_type = #tpu.core_type<tc>} {
    %0 = tpu.iota {dimensions = array<i32: 0>} : vector<2x8xi32>
    %1 = tpu.iota {dimensions = array<i32: 1>} : vector<2x8xi32>
    %c0_i32 = arith.constant 0 : i32
    %2 = vector.broadcast %c0_i32 : i32 to vector<2x8xi32>
    %3 = arith.cmpi eq, %0, %2 : vector<2x8xi32>
    %c4_i32 = arith.constant 4 : i32
    %4 = vector.broadcast %c4_i32 : i32 to vector<2x8xi32>
    %5 = arith.cmpi slt, %1, %4 : vector<2x8xi32>
    %6 = arith.andi %3, %5 : vector<2x8xi1>
    %c1_i32 = arith.constant 1 : i32
    %7 = vector.broadcast %c1_i32 : i32 to vector<2x8xi32>
    %8 = arith.cmpi eq, %0, %7 : vector<2x8xi32>
    %c4_i32_0 = arith.constant 4 : i32
    %9 = vector.broadcast %c4_i32_0 : i32 to vector<2x8xi32>
    %10 = arith.cmpi sge, %1, %9 : vector<2x8xi32>
    %11 = arith.andi %8, %10 : vector<2x8xi1>
    %c8_i32 = arith.constant 8 : i32
    %12 = vector.broadcast %c8_i32 : i32 to vector<2x8xi32>
    %13 = arith.cmpi slt, %1, %12 : vector<2x8xi32>
    %14 = arith.andi %11, %13 : vector<2x8xi1>
    %15 = arith.ori %6, %14 : vector<2x8xi1>
    %16 = arith.extui %15 : vector<2x8xi1> to vector<2x8xi32>
    %17 = arith.sitofp %16 : vector<2x8xi32> to vector<2x8xf32>
    %c0 = arith.constant 0 : index
    %c0_1 = arith.constant 0 : index
    %18 = vector.load %arg0[%c0, %c0_1] : memref<8x32xf32, #tpu.memory_space<vmem>>, vector<8x32xf32>
    %cst = arith.constant dense<0.000000e+00> : vector<2x32xf32>
    %19 = tpu.matmul %17, %18, %cst {dimension_numbers = #tpu.dot_dimension_numbers<[1], [0], [0], [1], [0, 0, 1, 1], [], []>} : vector<2x8xf32>, vector<8x32xf32>, vector<2x32xf32> -> vector<2x32xf32>
    %cst_2 = arith.constant 2.500000e-01 : f32
    %20 = vector.broadcast %cst_2 : f32 to vector<2x32xf32>
    %21 = arith.mulf %19, %20 : vector<2x32xf32>
    %c0_3 = arith.constant 0 : index
    %c0_4 = arith.constant 0 : index
    %22 = vector.load %arg1[%c0_3, %c0_4] : memref<2x32xf32, #tpu.memory_space<vmem>>, vector<2x32xf32>
    tpu.vector_store %arg1[%c0_3, %c0_4], %21 {strides = array<i32>} : memref<2x32xf32, #tpu.memory_space<vmem>>, vector<2x32xf32>,
    return
  }
}

</mosaic_0001>

<bundles_post_ra>
// kernel: class_proto_forward.1
= control target key start
LH: loop header
LB: loop body
LE: loop exit
PB: predicated region body
PF: predicated region fallthrough
CT: control target
= control target key end

     0   :  { %6 = vsyncpa [#allocation3], 0  ;;  %s152_s6 = smov [#allocation2]   ;;  %s171_s0 = inlined_call_operand.hbm [shape: f32[8,32], index: 0, kind: input, shape index: {}]   ;;  %s172_s1 = inlined_call_operand.vmem [shape: f32[2,32], index: 1, kind: output, shape index: {}]  }
   0x1   :  { %s13_s7 = sshll.u32 %s152_s6, 4  ;;  %s14_s7 = int_to_ptr.vmem [resolvable:$true] %s13_s7 }
   0x2   :  { %s138_s8 = scalar_lea.vmem %s14_s7, 128  ;;  %p143_p1 = scmp.lt.s32.totalorder %s14_s7, %s14_s7 }
   0x3   :  { %p139_p0 = scmp.ne.s32.totalorder %s14_s7, %s138_s8  ;;  %p144_p2 = scmp.lt.s32.totalorder %s138_s8, %s138_s8 }
   0x5   :  { %p145_p3 = por %p144_p2, %p143_p1 }
   0x7   :  { %p146_p4 = pnand %p145_p3, %p139_p0 }
   0x9   :  { %149 = shalt.err (!%p146_p4)
}
   0xa   :  { %16 = dma.hbm_to_vmem [thread:$0]  %s171_s0, 128, %s14_s7, [#allocation3]  }
   0xb   :  { %150 = dma.done.wait [#allocation3], 128  }
   0xc   :  { %151 = vsyncadd [#allocation3], 4294967168  ;;  %v20_v0 = vlaneseq  ;;  %v153_v1 = vmov 0.0   ;;  %vm154_vm0 = vmmov 0   ;;  %v35_v4 = vld [vmem:[#allocation2] sm:$0xff]  ;;  %vm36_vm9 = vcmask 64512  }
   0xd   :  { %122 = vmatprep.subr.mxu0 %v153_v1  ;;  %124 = vmatprep.mubr.msk.f32.mxu0 %vm154_vm0, %v153_v1  ;;  %vm111_vm11 = vcmask 254976  }
   0xe   :  { %v21_v2 = vshrl.u32 %v20_v0, 7  ;;  %v23_v3 = vand.u32 127, %v20_v0  ;;  %123 = vmatpush3.msra.mxu0 %v35_v4 }
  0x10   :  { %vm24_vm1 = vcmp.eq.s32.totalorder %v21_v2, 0  ;;  %vm25_vm2 = vcmp.lt.s32.totalorder %v23_v3, 4  ;;  %vm27_vm3 = vcmp.eq.s32.totalorder %v21_v2, 1  ;;  %vm28_vm4 = vcmp.ge.s32.totalorder %v23_v3, 4 }
  0x11   :  { %vm26_vm5 = vmand %vm24_vm1, %vm25_vm2  ;;  %vm30_vm6 = vcmp.lt.s32.totalorder %v23_v3, 8 }
  0x12   :  { %vm29_vm7 = vmand %vm27_vm3, %vm28_vm4 }
  0x13   :  { %vm31_vm8 = vmand %vm29_vm7, %vm30_vm6 }
  0x14   :  { %vm32_vm10 = vmor %vm26_vm5, %vm31_vm8 }
  0x15   :  { %v118_v5 = vsel %vm32_vm10, 1.0, %v153_v1 }
  0x16   :  { %125 = vmatmul.mubr.msk.f32.vlgmr.msra.gmra.mxu0 %vm36_vm9, %v118_v5 }
  0xd6   :  { %v106_v6 = vpop.f32.mrf.mxu0 }
  0xd7   :  { %v110_v7 = vmul.f32 0.25, %v106_v6 }
  0xd8   :  { %v126_v8 = vpop.f32.mrf.mxu0 }
  0xd9   :  { %112 = vst.msk [vmem:[%s172_s1] sm:$0x3] %vm111_vm11, %v110_v7 }
  0xda   :  { %117 = vsyncpa [#allocation3], 1 }

</bundles_post_ra>
